<compile_context>
chip_gen: v5e
topology: v5e:2x2
jax: 0.10.0
libtpu: 0.0.40
codegen_flags: <defaults>
</compile_context>

<pallas_src>
import functools

import jax
import jax.numpy as jnp
from jax import lax
from jax.experimental import pallas as pl
from jax.experimental.pallas import tpu as pltpu


def _round_up(x: int, m: int) -> int:
    return ((x + m - 1) // m) * m


def _vmem_capacity_bytes() -> int:
    try:
        return int(pltpu.get_tpu_info().vmem_capacity_bytes)
    except Exception:
        return 64 * 1024 * 1024  # conservative (v7x-sized) fallback


# ---------------------------------------------------------------------------
# Path A: small vocab -- VMEM-resident table + one-hot MXU gather
# ---------------------------------------------------------------------------

def _onehot_kernel(idx_ref, table_ref, out_ref, *, precision):
    """One row tile: out = onehot(idx, vocab) @ table (table VMEM-resident).

    idx_ref   : VMEM (tb, 1)      int32 indices for this row tile
    table_ref : VMEM (vocab, dim) whole table, resident across the grid
    out_ref   : VMEM (tb, dim)    output row tile
    """
    tb = out_ref.shape[0]
    vocab = table_ref.shape[0]

    idx = idx_ref[...]                                       # (tb, 1)
    # Grid-invariant iota; compare directly against the per-tile indices
    # (no per-step "+ v*tv" VPU add since there is no vocab chunking).
    col = lax.broadcasted_iota(jnp.int32, (tb, vocab), 1)
    onehot = (col == idx).astype(table_ref.dtype)            # exact 0/1
    out_ref[...] = jnp.dot(
        onehot,
        table_ref[...],
        preferred_element_type=jnp.float32,
        precision=precision,
    ).astype(out_ref.dtype)


def _embedding_onehot(table, flat_idx, out_prefix_shape,
                      tile_rows, vmem_limit, budget):
    vocab, dim = table.shape
    itemsize = jnp.dtype(table.dtype).itemsize
    n = flat_idx.shape[0]

    tb = min(_round_up(tile_rows, 32), _round_up(n, 32))

    def vmem_estimate(tb_):
        return (2 * vocab * dim * itemsize          # resident table block(s)
                + 2 * tb_ * dim * itemsize          # output blocks
                + 2 * tb_ * 128 * 4                 # lane-padded (tb,1) idx blocks
                + tb_ * vocab * (8 + itemsize))     # iota / compare / one-hot temps

    while vmem_estimate(tb) > budget and tb > 32:
        tb = max(32, _round_up(tb // 2, 32))

    n_pad = _round_up(n, tb)
    idx = jnp.pad(flat_idx, (0, n_pad - n)).reshape(n_pad, 1)

    # f32 tables: HIGHEST keeps the gather bit-exact through the MXU's bf16
    # passes.  This path is only auto-selected for small vocabularies, where
    # the matmul cost (even multi-pass) is negligible; large tables take the
    # DMA-gather path which has no precision issue at all.
    precision = lax.Precision.HIGHEST if table.dtype == jnp.float32 else None
    kernel = functools.partial(_onehot_kernel, precision=precision)

    out = pl.pallas_call(
        kernel,
        out_shape=jax.ShapeDtypeStruct((n_pad, dim), table.dtype),
        grid_spec=pltpu.PrefetchScalarGridSpec(
            num_scalar_prefetch=0,
            grid=(n_pad // tb,),
            in_specs=[
                pl.BlockSpec((tb, 1), lambda i: (i, 0)),        # indices
                pl.BlockSpec((vocab, dim), lambda i: (0, 0)),   # resident table
            ],
            out_specs=pl.BlockSpec((tb, dim), lambda i: (i, 0)),
        ),
        compiler_params=pltpu.CompilerParams(
            dimension_semantics=("parallel",),
            vmem_limit_bytes=vmem_limit,
        ),
    )(idx, table)

    return out[:n].reshape(tuple(out_prefix_shape) + (dim,))


# ---------------------------------------------------------------------------
# Path B: general case -- DMA row gather from HBM (table never re-streamed)
# ---------------------------------------------------------------------------

_GATHER_INFLIGHT = 16  # power of two: ring of outstanding row DMAs


def _gather_kernel(idx_ref, table_hbm, out_ref, row_buf, sems):
    """Fetch this row tile's `tb` table rows via a ring of async row DMAs.

    idx_ref   : SMEM (n_pad,)     int32 indices (scalar-prefetched)
    table_hbm : HBM  (vocab, dim) full table (memory_space=pl.ANY)
    out_ref   : VMEM (tb, dim)    output row tile
    row_buf   : VMEM (tb, dim)    staging buffer the DMAs land in
    sems      : DMA semaphores (_GATHER_INFLIGHT,)
    """
    i = pl.program_id(0)
    tb = out_ref.shape[0]
    nsem = sems.shape[0]                     # power of two
    base = i * tb

    def row_copy(dst_row, src_row):
        return pltpu.make_async_copy(
            table_hbm.at[pl.ds(src_row, 1), :],
            row_buf.at[pl.ds(dst_row, 1), :],
            sems.at[dst_row & (nsem - 1)],
        )

    def start(r):
        row_copy(r, idx_ref[base + r]).start()

    # Prime the ring of in-flight row fetches.
    @pl.loop(0, min(nsem, tb))
    def _(r):
        start(r)

    # Steady state: retire row r, immediately reuse its semaphore slot.
    @pl.loop(0, tb)
    def _(r):
        row_copy(r, 0).wait()                # wait only needs shape + semaphore

        @pl.when(r + nsem < tb)
        def _():
            start(r + nsem)

    # One lane-dense vector copy into the pipelined output block.
    out_ref[...] = row_buf[...]


def _embedding_gather(table, flat_idx, out_prefix_shape,
                      tile_rows, vmem_limit, budget):
    vocab, dim = table.shape
    itemsize = jnp.dtype(table.dtype).itemsize
    n = flat_idx.shape[0]

    tb = min(_round_up(tile_rows, 32), _round_up(n, 32))
    # Double-buffered output blocks + staging buffer must fit the budget.
    while 3 * tb * dim * itemsize > budget and tb > 32:
        tb = max(32, _round_up(tb // 2, 32))

    n_pad = _round_up(n, tb)
    idx = jnp.pad(flat_idx, (0, n_pad - n))  # pad with 0 (valid row, sliced off)

    # NOTE: the indices live in SMEM (scalar prefetch); for extremely large
    # index batches (multi-100K) split the call at the wrapper level.
    out = pl.pallas_call(
        _gather_kernel,
        out_shape=jax.ShapeDtypeStruct((n_pad, dim), table.dtype),
        grid_spec=pltpu.PrefetchScalarGridSpec(
            num_scalar_prefetch=1,                          # indices -> SMEM
            grid=(n_pad // tb,),
            in_specs=[pl.BlockSpec(memory_space=pl.ANY)],   # table stays in HBM
            out_specs=pl.BlockSpec((tb, dim), lambda i, idx_ref: (i, 0)),
            scratch_shapes=[
                pltpu.VMEM((tb, dim), table.dtype),         # row staging buffer
                pltpu.SemaphoreType.DMA((_GATHER_INFLIGHT,)),
            ],
        ),
        compiler_params=pltpu.CompilerParams(
            dimension_semantics=("parallel",),
            vmem_limit_bytes=vmem_limit,
        ),
    )(idx, table)

    return out[:n].reshape(tuple(out_prefix_shape) + (dim,))


# ---------------------------------------------------------------------------
# Public wrapper (Embedding.forward equivalent)
# ---------------------------------------------------------------------------

def embedding_lookup(
    table: jax.Array,
    indices: jax.Array,
    *,
    method: str | None = None,          # None (auto) | "gather" | "onehot"
    gather_tile_rows: int = 512,
    onehot_tile_rows: int = 256,
    onehot_max_vocab: int = 1024,
) -> jax.Array:
    """Pallas equivalent of Embedding.forward: pull rows of `table` at `indices`."""
    vocab, dim = table.shape

    flat_idx = indices.reshape(-1).astype(jnp.int32)
    n = flat_idx.shape[0]
    if n == 0:
        return jnp.zeros(tuple(indices.shape) + (dim,), table.dtype)

    # Out-of-range / negative indices are clamped into [0, vocab) (PyTorch's
    # Embedding would raise); the clamp also keeps every row DMA in bounds.
    flat_idx = jnp.clip(flat_idx, 0, vocab - 1)

    vmem_cap = _vmem_capacity_bytes()                      # 128 MiB v5e/v6e, 64 MiB v7x
    vmem_limit = max(32 * 1024 * 1024, min(int(0.6 * vmem_cap), 112 * 1024 * 1024))
    budget = int(0.8 * vmem_limit)

    if method is None:
        is_f32_bf16 = table.dtype in (jnp.float32, jnp.bfloat16)
        tb0 = min(_round_up(onehot_tile_rows, 32), _round_up(n, 32))
        onehot_vmem = (2 * vocab * dim * table.dtype.itemsize
                       + 2 * tb0 * dim * table.dtype.itemsize
                       + 2 * tb0 * 128 * 4
                       + tb0 * vocab * (8 + table.dtype.itemsize))
        # Small float vocab => resident one-hot matmul beats n tiny row DMAs;
        # everything else (large vocab, int/quantized tables) => DMA gather.
        if is_f32_bf16 and vocab <= onehot_max_vocab and onehot_vmem <= budget:
            method = "onehot"
        else:
            method = "gather"

    if method == "onehot":
        return _embedding_onehot(table, flat_idx, indices.shape,
                                 onehot_tile_rows, vmem_limit, budget)
    elif method == "gather":
        return _embedding_gather(table, flat_idx, indices.shape,
                                 gather_tile_rows, vmem_limit, budget)
    else:
        raise ValueError(f"unknown method: {method!r}")


# TODO(synk): backward (push_sparse_table gradient scatter-add to a parameter
# server) has no forward-pass Pallas equivalent; only forward is implemented.


if __name__ == "__main__":
    key = jax.random.PRNGKey(0)
    k_table, k_idx = jax.random.split(key)

    vocab = 64          # synthetic sparse-table size
    dimension = 128     # Embedding(dimension=128)

    # NormalInitializer() -> deterministic normal init of the table.
    table = jax.random.normal(k_table, (vocab, dimension), dtype=jnp.float32)

    # indices: batch=2, seq=8
    indices = jax.random.randint(k_idx, (2, 8), 0, vocab, dtype=jnp.int32)

    ref = table[indices]

    # Auto path (small vocab -> VMEM-resident one-hot matmul).
    out = jax.block_until_ready(embedding_lookup(table, indices))
    assert out.shape == (2, 8, dimension)
    assert out.dtype == jnp.float32
    assert jnp.allclose(out, ref, atol=1e-6), float(jnp.max(jnp.abs(out - ref)))

    # Forced DMA row-gather path (what large vocabularies use).
    out_g = jax.block_until_ready(embedding_lookup(table, indices, method="gather"))
    assert out_g.shape == (2, 8, dimension)
    assert out_g.dtype == jnp.float32
    assert jnp.allclose(out_g, ref), float(jnp.max(jnp.abs(out_g - ref)))

    print("KERNEL_OK")
</pallas_src>

<mosaic_0001>
module attributes {stable_mosaic.version = 11 : i64} {
  func.func @_onehot_kernel(%arg0: i32, %arg1: memref<32x1xi32, #tpu.memory_space<vmem>>, %arg2: memref<64x128xf32, #tpu.memory_space<vmem>>, %arg3: memref<32x128xf32, #tpu.memory_space<vmem>>) attributes {dimension_semantics = [#tpu.dimension_semantics<parallel>], iteration_bounds = array<i64: 1>, scalar_prefetch = 0 : i64, scratch_operands = 0 : i64, tpu.core_type = #tpu.core_type<tc>, window_params = [{transform_indices = @transform_0, window_bounds = array<i64: 32, 1>}, {pipeline_mode = #tpu.pipeline_mode<synchronous>, transform_indices = @transform_1, window_bounds = array<i64: 64, 128>}, {transform_indices = @transform_2, window_bounds = array<i64: 32, 128>}]} {
    %c0 = arith.constant 0 : index
    %c0_0 = arith.constant 0 : index
    %0 = vector.load %arg1[%c0, %c0_0] : memref<32x1xi32, #tpu.memory_space<vmem>>, vector<32x1xi32>
    %1 = tpu.iota {dimensions = array<i32: 1>} : vector<32x64xi32>
    %2 = vector.broadcast %0 : vector<32x1xi32> to vector<32x64xi32>
    %3 = arith.cmpi eq, %1, %2 : vector<32x64xi32>
    %4 = arith.extui %3 : vector<32x64xi1> to vector<32x64xi32>
    %5 = arith.sitofp %4 : vector<32x64xi32> to vector<32x64xf32>
    %c0_1 = arith.constant 0 : index
    %c0_2 = arith.constant 0 : index
    %6 = vector.load %arg2[%c0_1, %c0_2] : memref<64x128xf32, #tpu.memory_space<vmem>>, vector<64x128xf32>
    %cst = arith.constant dense<0.000000e+00> : vector<32x128xf32>
    %7 = tpu.matmul %5, %6, %cst {dimension_numbers = #tpu.dot_dimension_numbers<[1], [0], [0], [1], [0, 0, 1, 1], [], []>, precision = #tpu.contract_precision<fp32>} : vector<32x64xf32>, vector<64x128xf32>, vector<32x128xf32> -> vector<32x128xf32>
    %c0_3 = arith.constant 0 : index
    %c0_4 = arith.constant 0 : index
    %8 = vector.load %arg3[%c0_3, %c0_4] : memref<32x128xf32, #tpu.memory_space<vmem>>, vector<32x128xf32>
    tpu.vector_store %arg3[%c0_3, %c0_4], %7 {strides = array<i32>} : memref<32x128xf32, #tpu.memory_space<vmem>>, vector<32x128xf32>,
    return
  }
  func.func @transform_0(%arg0: i32) -> (i32, i32) {
    %c0_i32 = arith.constant 0 : i32
    %c0_i32_0 = arith.constant 0 : i32
    return %arg0, %c0_i32 : i32, i32
  }
  func.func @transform_1(%arg0: i32) -> (i32, i32) {
    %c0_i32 = arith.constant 0 : i32
    %c0_i32_0 = arith.constant 0 : i32
    %c0_i32_1 = arith.constant 0 : i32
    return %c0_i32, %c0_i32_0 : i32, i32
  }
  func.func @transform_2(%arg0: i32) -> (i32, i32) {
    %c0_i32 = arith.constant 0 : i32
    %c0_i32_0 = arith.constant 0 : i32
    return %arg0, %c0_i32 : i32, i32
  }
}

</mosaic_0001>

<bundles_post_ra>
// kernel: tpu_custom_call.1
= control target key start
LH: loop header
LB: loop body
LE: loop exit
PB: predicated region body
PF: predicated region fallthrough
CT: control target
= control target key end

     0   :  { %7 = vsyncpa [#allocation3], 0  ;;  %s669_s0 = inlined_call_operand.vmem [shape: s32[32,1], index: 0, kind: input, shape index: {}]   ;;  %s670_s1 = inlined_call_operand.hbm [shape: f32[64,128], index: 1, kind: input, shape index: {}]   ;;  %s671_s2 = inlined_call_operand.hbm [shape: f32[32,128], index: 2, kind: output, shape index: {}]  }
   0x1   :  { %8 = vsyncpa [#allocation4], 0  ;;  %s15_s11 = sshll.u32 %s670_s1, 4  ;;  %s524_s12 = smov [#allocation2]   ;;  %s16_s11 = int_to_ptr.hbm [resolvable:$true] %s15_s11 }
   0x2   :  { %s17_s13 = sshll.u32 %s524_s12, 4  ;;  %s525_s14 = smov 128   ;;  %s18_s13 = int_to_ptr.vmem [resolvable:$true] %s17_s13 }
   0x3   :  { %s526_s15 = smov 8  }
   0x4   :  { %23 = dma.hbm_to_vmem [thread:$0]  %s16_s11, 1024, %s18_s13, [#allocation3], %s525_s14, %s525_s14, %s526_s15  }
   0x5   :  { %520 = dma.done.wait [#allocation3], 1024  }
   0x6   :  { %521 = vsyncadd [#allocation3], 4294966272  ;;  %v527_v0 = vmov 0   ;;  %v30_v1 = vld [vmem:[%s669_s0 + $0x10] sm:$0xff]  ;;  %v28_v2 = vld [vmem:[%s669_s0] sm:$0xff]  ;;  %v32_v53 = vlaneseq  ;;  %vm66_vm0 = vcmask 523264  }
   0x7   :  { %471 = vset.pattern.permute.xlu1 %v527_v0  ;;  %470 = vset.pattern.permute.xlu0 %v527_v0  ;;  %v65_v3 = vld [vmem:[#allocation2 + $0x38] sm:$0xff]  ;;  %v64_v4 = vld [vmem:[#allocation2 + $0x30] sm:$0xff]  ;;  %v63_v7 = vld [vmem:[#allocation2 + $0x28] sm:$0xff]  ;;  %v528_v57 = vmov 0.0   ;;  %s419_s26 = sshll.u32 %s671_s2, 4  ;;  %s420_s26 = int_to_ptr.hbm [resolvable:$true] %s419_s26 }
   0x8   :  { %41 = vperm.xlu0 %470, %v30_v1   ;;  %35 = vperm.xlu1 %471, %v28_v2   ;;  %v557_v5 = vand.u32 4294901760, %v65_v3  ;;  %v559_v6 = vand.u32 4294901760, %v64_v4  ;;  %v62_v8 = vld [vmem:[#allocation2 + $0x20] sm:$0xff]  ;;  %v61_v9 = vld [vmem:[#allocation2 + $0x18] sm:$0xff]  ;;  %v561_v10 = vand.u32 4294901760, %v63_v7  ;;  %v60_v13 = vld [vmem:[#allocation2 + $0x10] sm:$0xff] }
   0x9   :  { %v563_v11 = vand.u32 4294901760, %v62_v8  ;;  %v565_v12 = vand.u32 4294901760, %v61_v9  ;;  %v59_v14 = vld [vmem:[#allocation2 + $0x8] sm:$0xff]  ;;  %v575_v17 = vand.u32 4294901760, %v60_v13  ;;  %v31_v22 = vld [vmem:[%s669_s0 + $0x18] sm:$0xff]  ;;  %v58_v47 = vld [vmem:[#allocation2] sm:$0xff] }
   0xa   :  { %v568_v15 = vsub.f32 %v65_v3, %v557_v5  ;;  %v571_v16 = vsub.f32 %v64_v4, %v559_v6  ;;  %88 = vmatpush.msra.mxu0 %v557_v5  ;;  %448 = vmatpush.msra.mxu2 %v557_v5  ;;  %v577_v18 = vand.u32 4294901760, %v59_v14  ;;  %v580_v19 = vsub.f32 %v63_v7, %v561_v10  ;;  %v29_v23 = vld [vmem:[%s669_s0 + $0x8] sm:$0xff]  ;;  %s529_s0 = smov [#allocation5]  }
   0xb   :  { %v583_v20 = vsub.f32 %v62_v8, %v563_v11  ;;  %v586_v21 = vsub.f32 %v61_v9, %v565_v12  ;;  %v597_v26 = vsub.f32 %v60_v13, %v575_v17  ;;  %v101_v48 = vand.u32 4294901760, %v58_v47  ;;  %s417_s23 = sshll.u32 %s529_s0, 4  ;;  %s418_s23 = int_to_ptr.vmem [resolvable:$true] %s417_s23 }
   0xc   :  { %v146_v24 = vand.u32 4294901760, %v568_v15  ;;  %v152_v25 = vand.u32 4294901760, %v571_v16  ;;  %90 = vmatpush.msra.mxu0 %v559_v6  ;;  %449 = vmatpush.msra.mxu2 %v559_v6  ;;  %v158_v27 = vand.u32 4294901760, %v580_v19  ;;  %v607_v32 = vsub.f32 %v59_v14, %v577_v18 }
   0xd   :  { %v164_v28 = vand.u32 4294901760, %v583_v20  ;;  %v170_v31 = vand.u32 4294901760, %v586_v21  ;;  %v176_v37 = vand.u32 4294901760, %v597_v26  ;;  %v187_v49 = vsub.f32 %v58_v47, %v101_v48 }
   0xe   :  { %v147_v29 = vsub.f32 %v568_v15, %v146_v24  ;;  %v153_v30 = vsub.f32 %v571_v16, %v152_v25  ;;  %92 = vmatpush.msra.mxu0 %v561_v10  ;;  %450 = vmatpush.msra.mxu2 %v561_v10  ;;  %v159_v33 = vsub.f32 %v580_v19, %v158_v27  ;;  %v182_v40 = vand.u32 4294901760, %v607_v32 }
   0xf   :  { %v165_v36 = vsub.f32 %v583_v20, %v164_v28  ;;  %v171_v39 = vsub.f32 %v586_v21, %v170_v31  ;;  %v177_v42 = vsub.f32 %v597_v26, %v176_v37  ;;  %v188_v50 = vand.u32 4294901760, %v187_v49 }
  0x10   :  { %44 = vperm.xlu0 %470, %v31_v22   ;;  %38 = vperm.xlu1 %471, %v29_v23   ;;  %v148_v34 = vand.u32 4294901760, %v147_v29  ;;  %v154_v35 = vand.u32 4294901760, %v153_v30  ;;  %v160_v38 = vand.u32 4294901760, %v159_v33  ;;  %v183_v44 = vsub.f32 %v607_v32, %v182_v40 }
  0x11   :  { %94 = vmatpush.msra.mxu0 %v563_v11  ;;  %451 = vmatpush.msra.mxu2 %v563_v11  ;;  %v166_v41 = vand.u32 4294901760, %v165_v36  ;;  %v172_v43 = vand.u32 4294901760, %v171_v39  ;;  %v178_v45 = vand.u32 4294901760, %v177_v42  ;;  %v189_v51 = vsub.f32 %v187_v49, %v188_v50 }
  0x12   :  { %149 = vmatpush.msra.mxu1 %v148_v34  ;;  %456 = vmatpush.msra.mxu3 %v148_v34  ;;  %v184_v46 = vand.u32 4294901760, %v183_v44  ;;  %v33_v54 = vand.u32 127, %v32_v53 }
  0x13   :  { %96 = vmatpush.msra.mxu0 %v565_v12  ;;  %452 = vmatpush.msra.mxu2 %v565_v12  ;;  %v190_v52 = vand.u32 4294901760, %v189_v51 }
  0x14   :  { %155 = vmatpush.msra.mxu1 %v154_v35  ;;  %457 = vmatpush.msra.mxu3 %v154_v35 }
  0x15   :  { %98 = vmatpush.msra.mxu0 %v575_v17  ;;  %453 = vmatpush.msra.mxu2 %v575_v17 }
  0x16   :  { %161 = vmatpush.msra.mxu1 %v160_v38  ;;  %458 = vmatpush.msra.mxu3 %v160_v38 }
  0x17   :  { %100 = vmatpush.msra.mxu0 %v577_v18  ;;  %454 = vmatpush.msra.mxu2 %v577_v18 }
  0x18   :  { %167 = vmatpush.msra.mxu1 %v166_v41  ;;  %459 = vmatpush.msra.mxu3 %v166_v41 }
  0x19   :  { %102 = vmatpush.msra.mxu0 %v101_v48  ;;  %455 = vmatpush.msra.mxu2 %v101_v48 }
  0x1a   :  { %173 = vmatpush.msra.mxu1 %v172_v43  ;;  %460 = vmatpush.msra.mxu3 %v172_v43 }
  0x1b   :  { %219 = vmatpush.msrb.mxu2 %v568_v15  ;;  %322 = vmatpush.msrb.mxu0 %v146_v24 }
  0x1c   :  { %179 = vmatpush.msra.mxu1 %v178_v45  ;;  %461 = vmatpush.msra.mxu3 %v178_v45 }
  0x1d   :  { %222 = vmatpush.msrb.mxu2 %v571_v16  ;;  %326 = vmatpush.msrb.mxu0 %v152_v25 }
  0x1e   :  { %185 = vmatpush.msra.mxu1 %v184_v46  ;;  %462 = vmatpush.msra.mxu3 %v184_v46 }
  0x1f   :  { %225 = vmatpush.msrb.mxu2 %v580_v19  ;;  %330 = vmatpush.msrb.mxu0 %v158_v27 }
  0x20   :  { %191 = vmatpush.msra.mxu1 %v190_v52  ;;  %463 = vmatpush.msra.mxu3 %v190_v52 }
  0x21   :  { %228 = vmatpush.msrb.mxu2 %v583_v20  ;;  %334 = vmatpush.msrb.mxu0 %v164_v28 }
  0x22   :  { %271 = vmatpush.msrb.mxu3 %v557_v5  ;;  %377 = vmatpush.msrb.mxu1 %v557_v5 }
  0x23   :  { %231 = vmatpush.msrb.mxu2 %v586_v21  ;;  %338 = vmatpush.msrb.mxu0 %v170_v31 }
  0x24   :  { %273 = vmatpush.msrb.mxu3 %v559_v6  ;;  %379 = vmatpush.msrb.mxu1 %v559_v6 }
  0x25   :  { %234 = vmatpush.msrb.mxu2 %v597_v26  ;;  %342 = vmatpush.msrb.mxu0 %v176_v37 }
  0x26   :  { %275 = vmatpush.msrb.mxu3 %v561_v10  ;;  %381 = vmatpush.msrb.mxu1 %v561_v10 }
  0x27   :  { %237 = vmatpush.msrb.mxu2 %v607_v32  ;;  %346 = vmatpush.msrb.mxu0 %v182_v40 }
  0x28   :  { %277 = vmatpush.msrb.mxu3 %v563_v11  ;;  %383 = vmatpush.msrb.mxu1 %v563_v11 }
  0x29   :  { %240 = vmatpush.msrb.mxu2 %v187_v49  ;;  %350 = vmatpush.msrb.mxu0 %v188_v50 }
  0x2a   :  { %279 = vmatpush.msrb.mxu3 %v565_v12  ;;  %385 = vmatpush.msrb.mxu1 %v565_v12 }
  0x2c   :  { %281 = vmatpush.msrb.mxu3 %v575_v17  ;;  %387 = vmatpush.msrb.mxu1 %v575_v17 }
  0x2e   :  { %283 = vmatpush.msrb.mxu3 %v577_v18  ;;  %389 = vmatpush.msrb.mxu1 %v577_v18 }
  0x30   :  { %285 = vmatpush.msrb.mxu3 %v101_v48  ;;  %391 = vmatpush.msrb.mxu1 %v101_v48 }
  0x7a   :  { %v42_v55 = vpop.permute.xlu0 %41  ;;  %v36_v56 = vpop.permute.xlu1 %35 }
  0x7b   :  { %vm48_vm1 = vcmp.eq.s32.totalorder %v33_v54, %v42_v55  ;;  %vm46_vm2 = vcmp.eq.s32.totalorder %v33_v54, %v36_v56 }
  0x7c   :  { %v434_v58 = vsel %vm48_vm1, 1.0, %v528_v57  ;;  %v432_v59 = vsel %vm46_vm2, 1.0, %v528_v57 }
  0x7d   :  { %v74_v60 = vsel %vm66_vm0, %v434_v58, 0  ;;  %v68_v61 = vsel %vm66_vm0, %v432_v59, 0  ;;  %436 = vmatmul.msk.f32.vlgmr.msra.gmra.mxu1 %vm66_vm0, %v432_v59  ;;  %438 = vmatmul.msk.f32.vlgmr.msra.gmra.mxu3 %vm66_vm0, %v434_v58 }
  0x7e   :  { %v120_v62 = vsub.f32 %v74_v60, %v74_v60  ;;  %v104_v63 = vsub.f32 %v68_v61, %v68_v61 }
  0x80   :  { %v105_v0 = vand.u32 4294901760, %v104_v63  ;;  %v121_v1 = vand.u32 4294901760, %v120_v62 }
  0x82   :  { %v45_v2 = vpop.permute.xlu0 %44  ;;  %v39_v3 = vpop.permute.xlu1 %38  ;;  %v106_v4 = vsub.f32 %v104_v63, %v105_v0  ;;  %v122_v5 = vsub.f32 %v120_v62, %v121_v1 }
  0x83   :  { %vm49_vm3 = vcmp.eq.s32.totalorder %v33_v54, %v45_v2  ;;  %vm47_vm4 = vcmp.eq.s32.totalorder %v33_v54, %v39_v3 }
  0x84   :  { %v435_v6 = vsel %vm49_vm3, 1.0, %v528_v57  ;;  %v433_v7 = vsel %vm47_vm4, 1.0, %v528_v57  ;;  %v107_v8 = vand.u32 4294901760, %v106_v4  ;;  %v123_v9 = vand.u32 4294901760, %v122_v5 }
  0x85   :  { %v77_v10 = vsel %vm66_vm0, %v435_v6, 0  ;;  %v71_v11 = vsel %vm66_vm0, %v433_v7, 0  ;;  %437 = vmatmul.msk.f32.gmra.mxu1 %vm66_vm0, %v433_v7  ;;  %439 = vmatmul.msk.f32.gmra.mxu3 %vm66_vm0, %v435_v6 }
  0x86   :  { %v128_v12 = vsub.f32 %v77_v10, %v77_v10  ;;  %v112_v13 = vsub.f32 %v71_v11, %v71_v11  ;;  %108 = vmatmul.f32.vlgmr.msra.gmra.mxu0 %v107_v8  ;;  %124 = vmatmul.f32.vlgmr.msra.gmra.mxu2 %v123_v9 }
  0x88   :  { %v113_v14 = vand.u32 4294901760, %v112_v13  ;;  %v129_v15 = vand.u32 4294901760, %v128_v12 }
  0x8a   :  { %v114_v16 = vsub.f32 %v112_v13, %v113_v14  ;;  %v130_v17 = vsub.f32 %v128_v12, %v129_v15 }
  0x8c   :  { %v115_v18 = vand.u32 4294901760, %v114_v16  ;;  %v131_v19 = vand.u32 4294901760, %v130_v17 }
  0x8d   :  { %289 = vmatmul.f32.vlgmr.msrb.gmra.mxu3 %v105_v0  ;;  %444 = vmatmul.msk.f32.vlgmr.msrb.gmra.mxu1 %vm66_vm0, %v432_v59 }
  0x8e   :  { %116 = vmatmul.f32.gmra.mxu0 %v115_v18  ;;  %132 = vmatmul.f32.gmra.mxu2 %v131_v19 }
  0x95   :  { %295 = vmatmul.f32.gmra.mxu3 %v113_v14  ;;  %445 = vmatmul.msk.f32.gmra.mxu1 %vm66_vm0, %v433_v7 }
  0x96   :  { %243 = vmatmul.f32.vlgmr.msrb.gmra.mxu2 %v104_v63  ;;  %440 = vmatmul.msk.f32.vlgmr.msrb.gmra.mxu0 %vm66_vm0, %v432_v59 }
  0x9d   :  { %301 = vmatmul.f32.gmra.mxu3 %v121_v1  ;;  %446 = vmatmul.msk.f32.gmra.mxu1 %vm66_vm0, %v434_v58 }
  0x9e   :  { %248 = vmatmul.f32.gmra.mxu2 %v112_v13  ;;  %441 = vmatmul.msk.f32.gmra.mxu0 %vm66_vm0, %v433_v7 }
  0xa5   :  { %307 = vmatmul.f32.gmra.mxu3 %v129_v15  ;;  %447 = vmatmul.msk.f32.gmra.mxu1 %vm66_vm0, %v435_v6 }
  0xa6   :  { %253 = vmatmul.f32.gmra.mxu2 %v120_v62  ;;  %442 = vmatmul.msk.f32.gmra.mxu0 %vm66_vm0, %v434_v58 }
  0xae   :  { %258 = vmatmul.f32.gmra.mxu2 %v128_v12  ;;  %443 = vmatmul.msk.f32.gmra.mxu0 %vm66_vm0, %v435_v6 }
  0xfa   :  { %v194_v22 = vpop.f32.mrf.mxu1 }
 0x100   :  { %v202_v20 = vpop.f32.mrf.mxu3 }
 0x102   :  { %v198_v26 = vpop.f32.mrf.mxu1 }
 0x103   :  { %v109_v21 = vpop.f32.mrf.mxu0 }
 0x104   :  { %v195_v30 = vadd.f32 %v194_v22, %v109_v21 }
 0x108   :  { %v206_v24 = vpop.f32.mrf.mxu3 }
 0x109   :  { %v125_v23 = vpop.f32.mrf.mxu2 }
 0x10a   :  { %v394_v31 = vpop.f32.mrf.mxu1  ;;  %v203_v45 = vadd.f32 %v202_v20, %v125_v23 }
 0x10b   :  { %v117_v25 = vpop.f32.mrf.mxu0 }
 0x10c   :  { %v199_v37 = vadd.f32 %v198_v26, %v117_v25 }
 0x110   :  { %v290_v28 = vpop.f32.mrf.mxu3 }
 0x111   :  { %v133_v27 = vpop.f32.mrf.mxu2 }
 0x112   :  { %v398_v42 = vpop.f32.mrf.mxu1  ;;  %v207_v54 = vadd.f32 %v206_v24, %v133_v27 }
 0x113   :  { %v353_v29 = vpop.f32.mrf.mxu0 }
 0x118   :  { %v296_v36 = vpop.f32.mrf.mxu3 }
 0x119   :  { %v244_v32 = vpop.f32.mrf.mxu2 }
 0x11a   :  { %v245_v33 = vadd.f32 %v244_v32, %v195_v30  ;;  %v402_v52 = vpop.f32.mrf.mxu1 }
 0x11b   :  { %v357_v39 = vpop.f32.mrf.mxu0 }
 0x11c   :  { %v291_v34 = vadd.f32 %v290_v28, %v245_v33 }
 0x11e   :  { %v354_v35 = vadd.f32 %v353_v29, %v291_v34 }
 0x120   :  { %v395_v38 = vadd.f32 %v394_v31, %v354_v35  ;;  %v302_v47 = vpop.f32.mrf.mxu3 }
 0x121   :  { %v249_v40 = vpop.f32.mrf.mxu2 }
 0x122   :  { %409 = vst [vmem:[#allocation5] sm:$0xff] %v395_v38  ;;  %v250_v41 = vadd.f32 %v249_v40, %v199_v37  ;;  %v406_v62 = vpop.f32.mrf.mxu1 }
 0x123   :  { %v361_v50 = vpop.f32.mrf.mxu0 }
 0x124   :  { %v297_v43 = vadd.f32 %v296_v36, %v250_v41 }
 0x126   :  { %v358_v44 = vadd.f32 %v357_v39, %v297_v43 }
 0x128   :  { %v399_v46 = vadd.f32 %v398_v42, %v358_v44  ;;  %v308_v58 = vpop.f32.mrf.mxu3 }
 0x129   :  { %v254_v48 = vpop.f32.mrf.mxu2 }
 0x12a   :  { %410 = vst [vmem:[#allocation5 + $0x8] sm:$0xff] %v399_v46  ;;  %v255_v49 = vadd.f32 %v254_v48, %v203_v45 }
 0x12b   :  { %v365_v60 = vpop.f32.mrf.mxu0 }
 0x12c   :  { %v303_v51 = vadd.f32 %v302_v47, %v255_v49 }
 0x12e   :  { %v362_v53 = vadd.f32 %v361_v50, %v303_v51 }
 0x130   :  { %v403_v55 = vadd.f32 %v402_v52, %v362_v53 }
 0x131   :  { %v259_v56 = vpop.f32.mrf.mxu2 }
 0x132   :  { %411 = vst [vmem:[#allocation5 + $0x10] sm:$0xff] %v403_v55  ;;  %v260_v57 = vadd.f32 %v259_v56, %v207_v54 }
 0x134   :  { %v309_v59 = vadd.f32 %v308_v58, %v260_v57 }
 0x136   :  { %v366_v61 = vadd.f32 %v365_v60, %v309_v59 }
 0x138   :  { %v407_v63 = vadd.f32 %v406_v62, %v366_v61 }
 0x13a   :  { %412 = vst [vmem:[#allocation5 + $0x18] sm:$0xff] %v407_v63 }
 0x13b   :  { %425 = dma.vmem_to_hbm [thread:$0]  %s418_s23, 512, %s420_s26, [#allocation4], %s525_s14, %s525_s14, %s526_s15  }
 0x13c   :  { %522 = dma.done.wait [#allocation4], 512  }
 0x13d   :  { %523 = vsyncadd [#allocation4], 4294966784 }
 0x13e   :  { %430 = vsyncpa [#allocation3], 1 }
 0x13f   :  { %431 = vsyncpa [#allocation4], 1 }

</bundles_post_ra>
